<compile_context>
chip_gen: v5e
topology: v5e:2x2
jax: 0.10.0
libtpu: 0.0.40
codegen_flags: <defaults>
</compile_context>

<pallas_src>
import math

import jax
import jax.numpy as jnp
from jax.experimental import pallas as pl
from jax.experimental.pallas import tpu as pltpu


# ---------------------------------------------------------------------------
# Pallas kernel: elementwise add on a lane-dense 2-D block.
#   x_ref : (block_rows, block_cols) tile of the flattened input
#   pe_ref: (1, block_cols) positional-encoding chunk (resident per L-chunk)
# ---------------------------------------------------------------------------
def _add_pe_kernel(x_ref, pe_ref, o_ref):
    o_ref[...] = x_ref[...] + pe_ref[...]   # (1, C) broadcasts over sublanes on VPU


def _tpu_vmem_and_cores():
    """Physical VMEM per TensorCore and a 'multiple TCs' heuristic (v7x)."""
    default_vmem = 64 * 1024 * 1024
    try:
        info = pltpu.get_tpu_info()
        vmem = int(getattr(info, "vmem_capacity_bytes", default_vmem))
    except Exception:
        vmem = default_vmem
    # v7x has 64 MiB VMEM per TC and 2 TCs/chip; v5e/v6e have 128 MiB and 1 TC.
    multi_core = vmem <= 64 * 1024 * 1024
    return vmem, multi_core


def _choose_block_shape(R: int, L: int, itemsize: int,
                        target_bytes: int, multi_core: bool):
    """Pick (block_rows, block_cols): sublane-multiple rows (dtype-aware),
    128-multiple cols, ~target_bytes per block, >=2 row steps on multi-TC chips."""
    sub = max(8, 32 // itemsize)      # f32 -> 8, bf16 -> 16, int8/fp8 -> 32
    lane = 128

    # --- columns (lane axis): full L if a sub-row slab fits the budget ---
    if sub * L * itemsize <= target_bytes or L <= lane:
        block_cols = L                                      # full extent: legal
    else:
        cols = (target_bytes // (sub * itemsize)) // lane * lane
        cols = max(lane, cols)
        block_cols = L if cols >= L else cols               # multiple of 128

    # --- rows (sublane axis) ---
    if R <= sub:
        block_rows = R                                      # full extent: legal
    else:
        rows = (target_bytes // max(block_cols * itemsize, 1)) // sub * sub
        rows = max(sub, rows)
        if multi_core:
            # ensure >= 2 grid steps on the parallel row axis (2 TensorCores)
            half = ((R + 1) // 2 + sub - 1) // sub * sub
            rows = min(rows, max(sub, half))
        block_rows = R if rows >= R else rows
    return block_rows, block_cols


def positional_encoding_forward(patch_input: jax.Array,
                                position_enc: jax.Array,
                                *,
                                target_block_bytes: int = 8 * 1024 * 1024,
                                min_pallas_bytes: int = 1 * 1024 * 1024,
                                force_pallas: bool = False) -> jax.Array:
    """patch_input: (B, C, N, D); position_enc: (N, D) -> (B, C, N, D)."""
    B, C, N, D = patch_input.shape
    assert position_enc.shape == (N, D)
    dtype = patch_input.dtype
    itemsize = jnp.dtype(dtype).itemsize

    total_bytes = B * C * N * D * itemsize
    if not force_pallas and total_bytes < min_pallas_bytes:
        # pallas_call fixed cost dominates at tiny sizes; fused XLA add is faster.
        return patch_input + position_enc.astype(dtype)[None, None, :, :]

    R = B * C            # broadcast axis for pe
    L = N * D            # lane-dense width; pe repeats with period L

    x2 = patch_input.reshape(R, L)
    pe2 = position_enc.astype(dtype).reshape(1, L)

    phys_vmem, multi_core = _tpu_vmem_and_cores()
    vmem_limit = phys_vmem // 2                       # 32 MiB on v7x, 64 MiB v5e/v6e
    # Leave room for 2x double-buffered input + 2x output + resident pe + slack.
    eff_target = max(256 * 1024, min(target_block_bytes, vmem_limit // 6))

    block_rows, block_cols = _choose_block_shape(R, L, itemsize,
                                                 eff_target, multi_core)
    grid = (pl.cdiv(R, block_rows), pl.cdiv(L, block_cols))

    out2 = pl.pallas_call(
        _add_pe_kernel,
        out_shape=jax.ShapeDtypeStruct((R, L), dtype),
        grid=grid,
        in_specs=[
            pl.BlockSpec((block_rows, block_cols), lambda i, j: (i, j)),  # streamed x
            pl.BlockSpec((1, block_cols), lambda i, j: (0, j)),           # resident pe
        ],
        out_specs=pl.BlockSpec((block_rows, block_cols), lambda i, j: (i, j)),
        input_output_aliases={0: 0},   # write result over x's HBM buffer
        compiler_params=pltpu.CompilerParams(
            dimension_semantics=("parallel", "parallel"),
            vmem_limit_bytes=int(vmem_limit),
        ),
    )(x2, pe2)

    return out2.reshape(B, C, N, D)


# ---------------------------------------------------------------------------
# Parameter setup (plain JAX glue) — mirrors PositionalEncoding.__init__
# ---------------------------------------------------------------------------
def init_position_enc(num_patches: int, d_model: int,
                      use_position_encoder: bool = True,
                      positional_encoding_type: str = "sincos",
                      dtype=jnp.float32) -> jax.Array:
    if not use_position_encoder:
        return jnp.zeros((num_patches, d_model), dtype=dtype)

    if positional_encoding_type == "sincos":
        assert d_model % 2 == 0, "sincos positional encoding requires even d_model"
        position = jnp.arange(0, num_patches, dtype=jnp.float32)[:, None]       # (N, 1)
        div_term = jnp.exp(jnp.arange(0, d_model, 2, dtype=jnp.float32)
                           * -(math.log(10000.0) / d_model))                     # (D/2,)
        pe = jnp.zeros((num_patches, d_model), dtype=jnp.float32)
        pe = pe.at[:, 0::2].set(jnp.sin(position * div_term))
        pe = pe.at[:, 1::2].set(jnp.cos(position * div_term))
        pe = pe - pe.mean()
        pe = pe / (jnp.std(pe, ddof=1) * 10.0)   # torch.std is unbiased (ddof=1)
        return pe.astype(dtype)
    elif positional_encoding_type == "random":
        # deterministic synthetic init (not a checkpoint load)
        return jax.random.normal(jax.random.PRNGKey(42),
                                 (num_patches, d_model)).astype(dtype)
    else:
        raise ValueError(f"{positional_encoding_type} is not a valid positional encoder.")


if __name__ == "__main__":
    # Small shapes consistent with the module:
    #   window_length=128, patch_length=16 -> num_patches=8, d_model=32
    B, C, N, D = 2, 4, 8, 32

    key = jax.random.PRNGKey(0)
    patch_input = jax.random.normal(key, (B, C, N, D), dtype=jnp.float32)

    position_enc = init_position_enc(N, D, use_position_encoder=True,
                                     positional_encoding_type="sincos",
                                     dtype=patch_input.dtype)

    ref = patch_input + position_enc[None, None, :, :]

    # Force the Pallas path so the kernel is actually exercised at demo size.
    out = positional_encoding_forward(patch_input, position_enc, force_pallas=True)
    out = jax.block_until_ready(out)
    assert out.shape == (B, C, N, D)
    assert jnp.allclose(out, ref, atol=1e-6), "mismatch vs reference (pallas path)"

    # Default path short-circuits to a fused XLA add at this tiny size.
    out_sc = jax.block_until_ready(
        positional_encoding_forward(patch_input, position_enc))
    assert jnp.allclose(out_sc, ref, atol=1e-6), "mismatch vs reference (xla path)"

    print("KERNEL_OK")
</pallas_src>

<mosaic_0001>
module attributes {stable_mosaic.version = 11 : i64} {
  func.func @_add_pe_kernel(%arg0: i32, %arg1: i32, %arg2: memref<8x256xf32, #tpu.memory_space<vmem>>, %arg3: memref<1x256xf32, #tpu.memory_space<vmem>>, %arg4: memref<8x256xf32, #tpu.memory_space<vmem>>) attributes {dimension_semantics = [#tpu.dimension_semantics<parallel>, #tpu.dimension_semantics<parallel>], iteration_bounds = array<i64: 1, 1>, scalar_prefetch = 0 : i64, scratch_operands = 0 : i64, tpu.core_type = #tpu.core_type<tc>, window_params = [{transform_indices = @transform_0, window_bounds = array<i64: 8, 256>}, {transform_indices = @transform_1, window_bounds = array<i64: 1, 256>}, {transform_indices = @transform_2, window_bounds = array<i64: 8, 256>}]} {
    %c0 = arith.constant 0 : index
    %c0_0 = arith.constant 0 : index
    %0 = vector.load %arg2[%c0, %c0_0] : memref<8x256xf32, #tpu.memory_space<vmem>>, vector<8x256xf32>
    %c0_1 = arith.constant 0 : index
    %c0_2 = arith.constant 0 : index
    %1 = vector.load %arg3[%c0_1, %c0_2] : memref<1x256xf32, #tpu.memory_space<vmem>>, vector<1x256xf32>
    %2 = vector.broadcast %1 : vector<1x256xf32> to vector<8x256xf32>
    %3 = arith.addf %0, %2 : vector<8x256xf32>
    %c0_3 = arith.constant 0 : index
    %c0_4 = arith.constant 0 : index
    %4 = vector.load %arg4[%c0_3, %c0_4] : memref<8x256xf32, #tpu.memory_space<vmem>>, vector<8x256xf32>
    tpu.vector_store %arg4[%c0_3, %c0_4], %3 {strides = array<i32>} : memref<8x256xf32, #tpu.memory_space<vmem>>, vector<8x256xf32>,
    return
  }
  func.func @transform_0(%arg0: i32, %arg1: i32) -> (i32, i32) {
    %c0_i32 = arith.constant 0 : i32
    return %arg0, %arg1 : i32, i32
  }
  func.func @transform_1(%arg0: i32, %arg1: i32) -> (i32, i32) {
    %c0_i32 = arith.constant 0 : i32
    %c0_i32_0 = arith.constant 0 : i32
    return %c0_i32, %arg1 : i32, i32
  }
  func.func @transform_2(%arg0: i32, %arg1: i32) -> (i32, i32) {
    %c0_i32 = arith.constant 0 : i32
    return %arg0, %arg1 : i32, i32
  }
}

</mosaic_0001>

<bundles_post_ra>
// kernel: tpu_custom_call.1
= control target key start
LH: loop header
LB: loop body
LE: loop exit
PB: predicated region body
PF: predicated region fallthrough
CT: control target
= control target key end

     0   :  { %7 = vsyncpa [#allocation3], 0  ;;  %s135_s0 = inlined_call_operand.hbm [shape: f32[8,256], index: 0, kind: input, shape index: {}, may-alias: {0,2}]   ;;  %s136_s1 = inlined_call_operand.vmem [shape: f32[1,256], index: 1, kind: input, shape index: {}]   ;;  %s137_s2 = inlined_call_operand.hbm [shape: f32[8,256], index: 2, kind: output, shape index: {}, may-alias: {0,2}]  }
   0x1   :  { %8 = vsyncpa [#allocation4], 0  ;;  %s14_s11 = sshll.u32 %s135_s0, 4  ;;  %s109_s12 = smov [#allocation2]   ;;  %s15_s11 = int_to_ptr.hbm [resolvable:$true] %s14_s11 }
   0x2   :  { %s16_s13 = sshll.u32 %s109_s12, 4  ;;  %s17_s13 = int_to_ptr.vmem [resolvable:$true] %s16_s13 }
   0x3   :  { %19 = dma.hbm_to_vmem [thread:$0]  %s15_s11, 256, %s17_s13, [#allocation3]  }
   0x4   :  { %105 = dma.done.wait [#allocation3], 256  }
   0x5   :  { %106 = vsyncadd [#allocation3], 4294967040  ;;  %v26_v0 = vld [vmem:[#allocation2] sm:$0xff]  ;;  %v27_v2 = vld [vmem:[#allocation2 + $0x8] sm:$0xff]  ;;  %s110_s16 = smov [#allocation5]   ;;  %s45_s0 = sshll.u32 %s137_s2, 4  ;;  %s46_s0 = int_to_ptr.hbm [resolvable:$true] %s45_s0 }
   0x6   :  { %v28_v1 = vld [vmem:[%s136_s1] sm:$0x3]  ;;  %s43_s17 = sshll.u32 %s110_s16, 4  ;;  %s44_s17 = int_to_ptr.vmem [resolvable:$true] %s43_s17 }
   0x7   :  { %v30_v3 = vperm.slane %v28_v1, 0  ;;  %v31_v4 = vperm.slane %v28_v1, 1 }
   0x9   :  { %v34_v5 = vadd.f32 %v30_v3, %v26_v0  ;;  %v35_v6 = vadd.f32 %v31_v4, %v27_v2 }
   0xb   :  { %36 = vst [vmem:[#allocation5] sm:$0xff] %v34_v5 }
   0xc   :  { %37 = vst [vmem:[#allocation5 + $0x8] sm:$0xff] %v35_v6 }
   0xd   :  { %48 = dma.vmem_to_hbm [thread:$0]  %s44_s17, 256, %s46_s0, [#allocation4]  }
   0xe   :  { %107 = dma.done.wait [#allocation4], 256  }
   0xf   :  { %108 = vsyncadd [#allocation4], 4294967040 }
  0x10   :  { %53 = vsyncpa [#allocation3], 1 }
  0x11   :  { %54 = vsyncpa [#allocation4], 1 }

</bundles_post_ra>
